<compile_context>
chip_gen: v7x
topology: tpu7x:2x2x1
jax: 0.10.0
libtpu: 0.0.40
codegen_flags: <defaults>
</compile_context>

<pallas_src>
import jax
import jax.numpy as jnp
from jax.experimental import pallas as pl
from jax.experimental.pallas import tpu as pltpu


def skip_guidance_kernel(gb_ref,        # SMEM (2,): gamma, beta (f32)
                         xcat_ref,      # (3C, HW) bf16: cat([x, x_down, x_up])
                         xres_ref,      # (C, HW)  f32 : residual x
                         w_sm_ref,      # (C, 3C)  bf16
                         msp_ref,       # (2HW, HW) bf16: [max ; mean] Toeplitz conv
                         w_se_ref,      # (C, 2C)  bf16: SE conv1x1 over [avg ; max]
                         w_fc1_ref,     # (C//16, C) bf16
                         w_fc2_ref,     # (C, C//16) bf16
                         w_out_ref,     # (C, C)   bf16
                         o_ref):        # (C, HW)
    # ---- smooth: one fused K=3C matmul (bf16 in, f32 accumulate) ----
    x_att = jnp.dot(w_sm_ref[...], xcat_ref[...],
                    preferred_element_type=jnp.float32)            # (C, HW) f32

    # ---- SpatialGate: ChannelPool -> 7x7 conv (one Toeplitz matmul) -> sigmoid ----
    ch_max = jnp.max(x_att, axis=0, keepdims=True)                  # (1, HW) f32
    ch_mean = jnp.mean(x_att, axis=0, keepdims=True)                # (1, HW) f32
    pooled_sp = jnp.concatenate([ch_max, ch_mean], axis=1).astype(jnp.bfloat16)  # (1, 2HW)
    conv = jnp.dot(pooled_sp, msp_ref[...],
                   preferred_element_type=jnp.float32)              # (1, HW) f32
    sp_gate = jax.nn.sigmoid(conv)                                  # (1, HW) f32

    # ---- SELayer: avg/max pool -> one conv1x1 matvec -> fc -> sigmoid ----
    y_avg = jnp.mean(x_att, axis=1, keepdims=True)                  # (C, 1) f32
    y_max = jnp.max(x_att, axis=1, keepdims=True)                   # (C, 1) f32
    pooled_ch = jnp.concatenate([y_avg, y_max], axis=0).astype(jnp.bfloat16)     # (2C, 1)
    y = jnp.dot(w_se_ref[...], pooled_ch,
                preferred_element_type=jnp.float32)                 # (C, 1) f32
    h = jnp.maximum(jnp.dot(w_fc1_ref[...], y.astype(jnp.bfloat16),
                            preferred_element_type=jnp.float32), 0.0)  # (C//16, 1)
    s = jax.nn.sigmoid(jnp.dot(w_fc2_ref[...], h.astype(jnp.bfloat16),
                               preferred_element_type=jnp.float32))    # (C, 1) f32

    # ---- fused gate combine + conv1x1 + residual + relu ----
    gamma = gb_ref[0]
    beta = gb_ref[1]
    # z = x_att + gamma*(x_att*sp) + beta*(x_att*s) == x_att * (1 + gamma*sp + beta*s)
    gate = 1.0 + gamma * sp_gate + beta * s                         # (C, HW) f32 (broadcast)
    z = (x_att * gate).astype(jnp.bfloat16)                         # (C, HW) bf16
    out = xres_ref[...] + jnp.dot(w_out_ref[...], z,
                                  preferred_element_type=jnp.float32)
    o_ref[...] = jnp.maximum(out, 0.0).astype(o_ref.dtype)


def _conv7x7_as_matrix(K, H, W):
    """Dense cross-correlation matrix for a 7x7 'same' conv.

    K: (2, 7, 7) weights (BN already folded).
    Returns (2*H*W, H*W) so that out_row = [max_row ; mean_row] @ M.
    """
    hi = jnp.arange(H)
    wi = jnp.arange(W)
    dh = hi[:, None] - hi[None, :] + 3            # (H_in, H_out) -> kernel row index
    dw = wi[:, None] - wi[None, :] + 3            # (W_in, W_out) -> kernel col index
    vh = (dh >= 0) & (dh < 7)
    vw = (dw >= 0) & (dw < 7)
    kh = jnp.clip(dh, 0, 6)
    kw = jnp.clip(dw, 0, 6)
    M = K[:, kh][:, :, :, kw]                     # (2, H_in, H_out, W_in, W_out)
    M = M * (vh[None, :, :, None, None] & vw[None, None, None, :, :]).astype(K.dtype)
    M = jnp.transpose(M, (0, 1, 3, 2, 4)).reshape(2, H * W, H * W)   # (c, in_pix, out_pix)
    return M.reshape(2 * H * W, H * W)


def init_params(key, C):
    std = 0.02
    ks = jax.random.split(key, 7)
    return dict(
        w_smooth=std * jax.random.normal(ks[0], (C, 3 * C, 1, 1), jnp.float32),  # OIHW
        w_sp=std * jax.random.normal(ks[1], (1, 2, 7, 7), jnp.float32),           # OIHW
        bn_w=std * jax.random.normal(ks[2], (1,), jnp.float32),                   # BN(1) weight
        w_se=std * jax.random.normal(ks[3], (C, 2 * C, 1, 1), jnp.float32),       # OIHW
        w_fc1=std * jax.random.normal(ks[4], (C // 16, C), jnp.float32),          # (out,in)
        w_fc2=std * jax.random.normal(ks[5], (C, C // 16), jnp.float32),          # (out,in)
        w_out=std * jax.random.normal(ks[6], (C, C, 1, 1), jnp.float32),          # OIHW
        gamma=jnp.array(1.0, jnp.float32),
        beta=jnp.array(1.0, jnp.float32),
    )


def skip_guidance_pallas(x, x_up, x_down, p):
    # inputs are NCHW (PyTorch convention); no spatial layout transposes needed.
    B, C, H, W = x.shape
    HW = H * W
    assert C % 16 == 0, "SELayer reduction assumes C % 16 == 0"
    assert HW <= 1024, "dense Toeplitz spatial-conv path only for small feature maps"

    # Pre-stack cat([x, x_down, x_up]) per batch -> (B, 3C, HW), bf16 MXU operand.
    xcat = jnp.concatenate([x, x_down, x_up], axis=1).reshape(B, 3 * C, HW)
    xcat = xcat.astype(jnp.bfloat16)
    xres = x.reshape(B, C, HW).astype(jnp.float32)        # residual stays f32

    # 1x1-conv weights as (out, in) matrices, bf16 for the MXU.
    w_sm = p['w_smooth'][:, :, 0, 0].astype(jnp.bfloat16)   # (C, 3C), order [x, x_down, x_up]
    w_se = p['w_se'][:, :, 0, 0].astype(jnp.bfloat16)       # (C, 2C), order [avg, max]
    w_fc1 = p['w_fc1'].astype(jnp.bfloat16)                  # (C//16, C)
    w_fc2 = p['w_fc2'].astype(jnp.bfloat16)                  # (C, C//16)
    w_out = p['w_out'][:, :, 0, 0].astype(jnp.bfloat16)      # (C, C)

    # Fold eval-mode BN (mean=0, var=1, bias=0) into the 7x7 spatial conv and
    # express the conv as a dense Toeplitz matmul.
    bn_scale = p['bn_w'][0] / jnp.sqrt(jnp.float32(1.0 + 1e-5))
    Ksp = p['w_sp'][0] * bn_scale                            # (2, 7, 7): [max, mean]
    msp = _conv7x7_as_matrix(Ksp, H, W).astype(jnp.bfloat16)  # (2*HW, HW)

    gb = jnp.stack([p['gamma'], p['beta']]).astype(jnp.float32)   # (2,)

    act_spec3 = pl.BlockSpec((None, 3 * C, HW), lambda b: (b, 0, 0))   # batch squeezed
    act_spec = pl.BlockSpec((None, C, HW), lambda b: (b, 0, 0))        # batch squeezed
    full_spec = lambda w: pl.BlockSpec(w.shape, lambda b: (0,) * w.ndim)
    smem_spec = pl.BlockSpec(memory_space=pltpu.MemorySpace.SMEM)

    out_flat = pl.pallas_call(
        skip_guidance_kernel,
        out_shape=jax.ShapeDtypeStruct((B, C, HW), x.dtype),
        grid=(B,),
        in_specs=[smem_spec,
                  act_spec3, act_spec,
                  full_spec(w_sm), full_spec(msp), full_spec(w_se),
                  full_spec(w_fc1), full_spec(w_fc2), full_spec(w_out)],
        out_specs=act_spec,
        compiler_params=pltpu.CompilerParams(dimension_semantics=("parallel",)),
    )(gb, xcat, xres, w_sm, msp, w_se, w_fc1, w_fc2, w_out)

    return out_flat.reshape(B, C, H, W)


def ref_forward(x, x_up, x_down, p):
    """Pure-JAX f32 reference mirroring the PyTorch forward (eval-mode BN)."""
    conv1x1 = lambda t, w: jnp.einsum('bchw,oc->bohw', t, w[:, :, 0, 0])
    cat = jnp.concatenate([x, x_down, x_up], axis=1)
    x_att = conv1x1(cat, p['w_smooth'])
    # SpatialGate
    comp = jnp.stack([jnp.max(x_att, axis=1), jnp.mean(x_att, axis=1)], axis=1)
    sp = jax.lax.conv_general_dilated(comp, p['w_sp'], (1, 1),
                                      padding=((3, 3), (3, 3)),
                                      dimension_numbers=('NCHW', 'OIHW', 'NCHW'))
    bn_scale = p['bn_w'] / jnp.sqrt(1.0 + 1e-5)
    sp = jax.nn.sigmoid(sp * bn_scale[None, :, None, None])
    sp_att = x_att * sp
    # SELayer
    y_avg = jnp.mean(x_att, axis=(2, 3))
    y_max = jnp.max(x_att, axis=(2, 3))
    y = jnp.concatenate([y_avg, y_max], axis=1)
    y = y @ p['w_se'][:, :, 0, 0].T
    h = jax.nn.relu(y @ p['w_fc1'].T)
    s = jax.nn.sigmoid(h @ p['w_fc2'].T)
    ch_att = x_att * s[:, :, None, None]
    z = x_att + p['gamma'] * sp_att + p['beta'] * ch_att
    return jax.nn.relu(x + conv1x1(z, p['w_out']))


if __name__ == "__main__":
    key = jax.random.PRNGKey(0)
    B, C, H, W = 2, 32, 16, 16          # inplanes=32 so SE reduction (C//16=2) is valid
    kx, ku, kd, kp = jax.random.split(key, 4)
    x = jax.random.normal(kx, (B, C, H, W), jnp.float32)
    x_up = jax.random.normal(ku, (B, C, H, W), jnp.float32)
    x_down = jax.random.normal(kd, (B, C, H, W), jnp.float32)
    params = init_params(kp, C)

    out = skip_guidance_pallas(x, x_up, x_down, params)
    out = jax.block_until_ready(out)

    ref = ref_forward(x, x_up, x_down, params)
    assert out.shape == ref.shape == (B, C, H, W)
    assert jnp.allclose(out, ref, rtol=2e-2, atol=2e-2), (
        float(jnp.max(jnp.abs(out - ref))))
    print("KERNEL_OK")
</pallas_src>

<mosaic_0001>
module attributes {stable_mosaic.version = 11 : i64} {
  func.func @skip_guidance_kernel(%arg0: i32, %arg1: memref<2xf32, #tpu.memory_space<smem>>, %arg2: memref<1x96x256xbf16, #tpu.memory_space<vmem>>, %arg3: memref<1x32x256xf32, #tpu.memory_space<vmem>>, %arg4: memref<32x96xbf16, #tpu.memory_space<vmem>>, %arg5: memref<512x256xbf16, #tpu.memory_space<vmem>>, %arg6: memref<32x64xbf16, #tpu.memory_space<vmem>>, %arg7: memref<2x32xbf16, #tpu.memory_space<vmem>>, %arg8: memref<32x2xbf16, #tpu.memory_space<vmem>>, %arg9: memref<32x32xbf16, #tpu.memory_space<vmem>>, %arg10: memref<1x32x256xf32, #tpu.memory_space<vmem>>) attributes {dimension_semantics = [#tpu.dimension_semantics<parallel>], iteration_bounds = array<i64: 2>, scalar_prefetch = 0 : i64, scratch_operands = 0 : i64, tpu.core_type = #tpu.core_type<tc>, window_params = [{transform_indices = @transform_0, window_bounds = array<i64: 2>}, {transform_indices = @transform_1, window_bounds = array<i64: 1, 96, 256>}, {transform_indices = @transform_2, window_bounds = array<i64: 1, 32, 256>}, {pipeline_mode = #tpu.pipeline_mode<synchronous>, transform_indices = @transform_3, window_bounds = array<i64: 32, 96>}, {pipeline_mode = #tpu.pipeline_mode<synchronous>, transform_indices = @transform_4, window_bounds = array<i64: 512, 256>}, {pipeline_mode = #tpu.pipeline_mode<synchronous>, transform_indices = @transform_5, window_bounds = array<i64: 32, 64>}, {pipeline_mode = #tpu.pipeline_mode<synchronous>, transform_indices = @transform_6, window_bounds = array<i64: 2, 32>}, {pipeline_mode = #tpu.pipeline_mode<synchronous>, transform_indices = @transform_7, window_bounds = array<i64: 32, 2>}, {pipeline_mode = #tpu.pipeline_mode<synchronous>, transform_indices = @transform_8, window_bounds = array<i64: 32, 32>}, {transform_indices = @transform_9, window_bounds = array<i64: 1, 32, 256>}]} {
    %c0 = arith.constant 0 : index
    %c0_0 = arith.constant 0 : index
    %0 = vector.load %arg4[%c0, %c0_0] : memref<32x96xbf16, #tpu.memory_space<vmem>>, vector<32x96xbf16>
    %c0_1 = arith.constant 0 : index
    %c0_2 = arith.constant 0 : index
    %c0_3 = arith.constant 0 : index
    %1 = vector.load %arg2[%c0_1, %c0_2, %c0_3] : memref<1x96x256xbf16, #tpu.memory_space<vmem>>, vector<1x96x256xbf16>
    %2 = vector.shape_cast %1 : vector<1x96x256xbf16> to vector<96x256xbf16>
    %cst = arith.constant dense<0.000000e+00> : vector<32x256xf32>
    %3 = tpu.matmul %0, %2, %cst {dimension_numbers = #tpu.dot_dimension_numbers<[1], [0], [0], [1], [0, 0, 1, 1], [], []>} : vector<32x96xbf16>, vector<96x256xbf16>, vector<32x256xf32> -> vector<32x256xf32>
    %cst_4 = arith.constant dense<0xFF800000> : vector<256xf32>
    %4 = vector.multi_reduction <maximumf>, %3, %cst_4 [0] : vector<32x256xf32> to vector<256xf32>
    %5 = vector.shape_cast %4 : vector<256xf32> to vector<1x256xf32>
    %cst_5 = arith.constant dense<0.000000e+00> : vector<256xf32>
    %6 = vector.multi_reduction <add>, %3, %cst_5 [0] : vector<32x256xf32> to vector<256xf32>
    %7 = vector.shape_cast %6 : vector<256xf32> to vector<1x256xf32>
    %cst_6 = arith.constant 3.200000e+01 : f32
    %8 = vector.broadcast %cst_6 : f32 to vector<1x256xf32>
    %9 = arith.divf %7, %8 : vector<1x256xf32>
    %10 = tpu.concatenate %5, %9 in 1 : vector<1x256xf32>, vector<1x256xf32> -> vector<1x512xf32>
    %11 = arith.truncf %10 : vector<1x512xf32> to vector<1x512xbf16>
    %c0_7 = arith.constant 0 : index
    %c0_8 = arith.constant 0 : index
    %12 = vector.load %arg5[%c0_7, %c0_8] : memref<512x256xbf16, #tpu.memory_space<vmem>>, vector<512x256xbf16>
    %cst_9 = arith.constant dense<0.000000e+00> : vector<1x256xf32>
    %13 = tpu.matmul %11, %12, %cst_9 {dimension_numbers = #tpu.dot_dimension_numbers<[1], [0], [0], [1], [0, 0, 1, 1], [], []>} : vector<1x512xbf16>, vector<512x256xbf16>, vector<1x256xf32> -> vector<1x256xf32>
    %14 = arith.negf %13 : vector<1x256xf32>
    %15 = math.exp %14 : vector<1x256xf32>
    %cst_10 = arith.constant 1.000000e+00 : f32
    %16 = vector.broadcast %cst_10 : f32 to vector<1x256xf32>
    %17 = arith.addf %16, %15 : vector<1x256xf32>
    %18 = arith.divf %16, %17 : vector<1x256xf32>
    %cst_11 = arith.constant dense<0.000000e+00> : vector<32xf32>
    %19 = vector.multi_reduction <add>, %3, %cst_11 [1] : vector<32x256xf32> to vector<32xf32>
    %20 = vector.shape_cast %19 : vector<32xf32> to vector<32x1xf32>
    %cst_12 = arith.constant 2.560000e+02 : f32
    %21 = vector.broadcast %cst_12 : f32 to vector<32x1xf32>
    %22 = arith.divf %20, %21 : vector<32x1xf32>
    %cst_13 = arith.constant dense<0xFF800000> : vector<32xf32>
    %23 = vector.multi_reduction <maximumf>, %3, %cst_13 [1] : vector<32x256xf32> to vector<32xf32>
    %24 = vector.shape_cast %23 : vector<32xf32> to vector<32x1xf32>
    %25 = tpu.concatenate %22, %24 in 0 : vector<32x1xf32>, vector<32x1xf32> -> vector<64x1xf32>
    %26 = arith.truncf %25 : vector<64x1xf32> to vector<64x1xbf16>
    %c0_14 = arith.constant 0 : index
    %c0_15 = arith.constant 0 : index
    %27 = vector.load %arg6[%c0_14, %c0_15] : memref<32x64xbf16, #tpu.memory_space<vmem>>, vector<32x64xbf16>
    %cst_16 = arith.constant dense<0.000000e+00> : vector<32x1xf32>
    %28 = tpu.matmul %27, %26, %cst_16 {dimension_numbers = #tpu.dot_dimension_numbers<[1], [0], [0], [1], [0, 0, 1, 1], [], []>} : vector<32x64xbf16>, vector<64x1xbf16>, vector<32x1xf32> -> vector<32x1xf32>
    %c0_17 = arith.constant 0 : index
    %c0_18 = arith.constant 0 : index
    %29 = vector.load %arg7[%c0_17, %c0_18] : memref<2x32xbf16, #tpu.memory_space<vmem>>, vector<2x32xbf16>
    %30 = arith.truncf %28 : vector<32x1xf32> to vector<32x1xbf16>
    %cst_19 = arith.constant dense<0.000000e+00> : vector<2x1xf32>
    %31 = tpu.matmul %29, %30, %cst_19 {dimension_numbers = #tpu.dot_dimension_numbers<[1], [0], [0], [1], [0, 0, 1, 1], [], []>} : vector<2x32xbf16>, vector<32x1xbf16>, vector<2x1xf32> -> vector<2x1xf32>
    %cst_20 = arith.constant 0.000000e+00 : f32
    %32 = vector.broadcast %cst_20 : f32 to vector<2x1xf32>
    %33 = arith.maximumf %31, %32 : vector<2x1xf32>
    %c0_21 = arith.constant 0 : index
    %c0_22 = arith.constant 0 : index
    %34 = vector.load %arg8[%c0_21, %c0_22] : memref<32x2xbf16, #tpu.memory_space<vmem>>, vector<32x2xbf16>
    %35 = arith.truncf %33 : vector<2x1xf32> to vector<2x1xbf16>
    %cst_23 = arith.constant dense<0.000000e+00> : vector<32x1xf32>
    %36 = tpu.matmul %34, %35, %cst_23 {dimension_numbers = #tpu.dot_dimension_numbers<[1], [0], [0], [1], [0, 0, 1, 1], [], []>} : vector<32x2xbf16>, vector<2x1xbf16>, vector<32x1xf32> -> vector<32x1xf32>
    %37 = arith.negf %36 : vector<32x1xf32>
    %38 = math.exp %37 : vector<32x1xf32>
    %cst_24 = arith.constant 1.000000e+00 : f32
    %39 = vector.broadcast %cst_24 : f32 to vector<32x1xf32>
    %40 = arith.addf %39, %38 : vector<32x1xf32>
    %41 = arith.divf %39, %40 : vector<32x1xf32>
    %c0_25 = arith.constant 0 : index
    %42 = memref.load %arg1[%c0_25] : memref<2xf32, #tpu.memory_space<smem>>
    %c1 = arith.constant 1 : index
    %43 = memref.load %arg1[%c1] : memref<2xf32, #tpu.memory_space<smem>>
    %44 = vector.broadcast %42 : f32 to vector<1x256xf32>
    %45 = arith.mulf %44, %18 : vector<1x256xf32>
    %cst_26 = arith.constant 1.000000e+00 : f32
    %46 = vector.broadcast %cst_26 : f32 to vector<1x256xf32>
    %47 = arith.addf %46, %45 : vector<1x256xf32>
    %48 = vector.broadcast %43 : f32 to vector<32x1xf32>
    %49 = arith.mulf %48, %41 : vector<32x1xf32>
    %50 = vector.broadcast %47 : vector<1x256xf32> to vector<32x256xf32>
    %51 = vector.broadcast %49 : vector<32x1xf32> to vector<32x256xf32>
    %52 = arith.addf %50, %51 : vector<32x256xf32>
    %53 = arith.mulf %3, %52 : vector<32x256xf32>
    %54 = arith.truncf %53 : vector<32x256xf32> to vector<32x256xbf16>
    %c0_27 = arith.constant 0 : index
    %c0_28 = arith.constant 0 : index
    %c0_29 = arith.constant 0 : index
    %55 = vector.load %arg3[%c0_27, %c0_28, %c0_29] : memref<1x32x256xf32, #tpu.memory_space<vmem>>, vector<1x32x256xf32>
    %56 = vector.shape_cast %55 : vector<1x32x256xf32> to vector<32x256xf32>
    %c0_30 = arith.constant 0 : index
    %c0_31 = arith.constant 0 : index
    %57 = vector.load %arg9[%c0_30, %c0_31] : memref<32x32xbf16, #tpu.memory_space<vmem>>, vector<32x32xbf16>
    %cst_32 = arith.constant dense<0.000000e+00> : vector<32x256xf32>
    %58 = tpu.matmul %57, %54, %cst_32 {dimension_numbers = #tpu.dot_dimension_numbers<[1], [0], [0], [1], [0, 0, 1, 1], [], []>} : vector<32x32xbf16>, vector<32x256xbf16>, vector<32x256xf32> -> vector<32x256xf32>
    %59 = arith.addf %56, %58 : vector<32x256xf32>
    %cst_33 = arith.constant 0.000000e+00 : f32
    %60 = vector.broadcast %cst_33 : f32 to vector<32x256xf32>
    %61 = arith.maximumf %59, %60 : vector<32x256xf32>
    %c0_34 = arith.constant 0 : index
    %c0_35 = arith.constant 0 : index
    %c0_36 = arith.constant 0 : index
    %62 = vector.load %arg10[%c0_34, %c0_35, %c0_36] : memref<1x32x256xf32, #tpu.memory_space<vmem>>, vector<1x32x256xf32>
    %63 = vector.shape_cast %62 : vector<1x32x256xf32> to vector<32x256xf32>
    %64 = vector.shape_cast %61 : vector<32x256xf32> to vector<1x32x256xf32>
    tpu.vector_store %arg10[%c0_34, %c0_35, %c0_36], %64 {strides = array<i32>} : memref<1x32x256xf32, #tpu.memory_space<vmem>>, vector<1x32x256xf32>,
    return
  }
  func.func @transform_0(%arg0: i32) -> i32 {
    %c0_i32 = arith.constant 0 : i32
    %c0_i32_0 = arith.constant 0 : i32
    return %c0_i32 : i32
  }
  func.func @transform_1(%arg0: i32) -> (i32, i32, i32) {
    %c0_i32 = arith.constant 0 : i32
    %c0_i32_0 = arith.constant 0 : i32
    %c0_i32_1 = arith.constant 0 : i32
    return %arg0, %c0_i32, %c0_i32_0 : i32, i32, i32
  }
  func.func @transform_2(%arg0: i32) -> (i32, i32, i32) {
    %c0_i32 = arith.constant 0 : i32
    %c0_i32_0 = arith.constant 0 : i32
    %c0_i32_1 = arith.constant 0 : i32
    return %arg0, %c0_i32, %c0_i32_0 : i32, i32, i32
  }
  func.func @transform_3(%arg0: i32) -> (i32, i32) {
    %c0_i32 = arith.constant 0 : i32
    %c0_i32_0 = arith.constant 0 : i32
    %c0_i32_1 = arith.constant 0 : i32
    return %c0_i32, %c0_i32_0 : i32, i32
  }
  func.func @transform_4(%arg0: i32) -> (i32, i32) {
    %c0_i32 = arith.constant 0 : i32
    %c0_i32_0 = arith.constant 0 : i32
    %c0_i32_1 = arith.constant 0 : i32
    return %c0_i32, %c0_i32_0 : i32, i32
  }
  func.func @transform_5(%arg0: i32) -> (i32, i32) {
    %c0_i32 = arith.constant 0 : i32
    %c0_i32_0 = arith.constant 0 : i32
    %c0_i32_1 = arith.constant 0 : i32
    return %c0_i32, %c0_i32_0 : i32, i32
  }
  func.func @transform_6(%arg0: i32) -> (i32, i32) {
    %c0_i32 = arith.constant 0 : i32
    %c0_i32_0 = arith.constant 0 : i32
    %c0_i32_1 = arith.constant 0 : i32
    return %c0_i32, %c0_i32_0 : i32, i32
  }
  func.func @transform_7(%arg0: i32) -> (i32, i32) {
    %c0_i32 = arith.constant 0 : i32
    %c0_i32_0 = arith.constant 0 : i32
    %c0_i32_1 = arith.constant 0 : i32
    return %c0_i32, %c0_i32_0 : i32, i32
  }
  func.func @transform_8(%arg0: i32) -> (i32, i32) {
    %c0_i32 = arith.constant 0 : i32
    %c0_i32_0 = arith.constant 0 : i32
    %c0_i32_1 = arith.constant 0 : i32
    return %c0_i32, %c0_i32_0 : i32, i32
  }
  func.func @transform_9(%arg0: i32) -> (i32, i32, i32) {
    %c0_i32 = arith.constant 0 : i32
    %c0_i32_0 = arith.constant 0 : i32
    %c0_i32_1 = arith.constant 0 : i32
    return %arg0, %c0_i32, %c0_i32_0 : i32, i32, i32
  }
}

</mosaic_0001>

<bundles_post_ra>
// kernel: tpu_custom_call.1
= control target key start
LH: loop header
LB: loop body
LE: loop exit
PB: predicated region body
PF: predicated region fallthrough
CT: control target
= control target key end

     0   :  { %s2783_s0 = inlined_call_operand.hbm [shape: f32[2], index: 0, kind: input, shape index: {}]   ;;  %s2784_s1 = inlined_call_operand.hbm [shape: bf16[2,96,256], index: 1, kind: input, shape index: {}]   ;;  %s2785_s2 = inlined_call_operand.hbm [shape: f32[2,32,256], index: 2, kind: input, shape index: {}]   ;;  %s2786_s3 = inlined_call_operand.vmem [shape: bf16[32,96], index: 3, kind: input, shape index: {}]   ;;  %s2787_s4 = inlined_call_operand.hbm [shape: bf16[512,256], index: 4, kind: input, shape index: {}]   ;;  %s2788_s5 = inlined_call_operand.vmem [shape: bf16[32,64], index: 5, kind: input, shape index: {}]   ;;  %s2789_s6 = inlined_call_operand.vmem [shape: bf16[2,32], index: 6, kind: input, shape index: {}]   ;;  %s2790_s7 = inlined_call_operand.vmem [shape: bf16[32,2], index: 7, kind: input, shape index: {}]   ;;  %s2791_s8 = inlined_call_operand.hbm [shape: bf16[32,32], index: 8, kind: input, shape index: {}]   ;;  %s2792_s9 = inlined_call_operand.hbm [shape: f32[2,32,256], index: 9, kind: output, shape index: {}]  }
   0x1   :  { %2801 = sst [smem:[#allocation21_spill]] %s2783_s0 }
   0x2   :  { %2802 = sst [smem:[#allocation22_spill]] %s2784_s1 }
   0x3   :  { %2803 = sst [smem:[#allocation23_spill]] %s2787_s4 }
   0x4   :  { %2804 = sst [smem:[#allocation24_spill]] %s2791_s8 }
   0x5   :  { %2805 = sst [smem:[#allocation25_spill]] %s2792_s9 }
   0x6   :  { %14 = vsyncpa [#allocation5], 0 }
   0x7   :  { %15 = vsyncpa [#allocation3], 0 }
   0x8   :  { %17 = vsyncpa [#allocation3 + $0x1], 0 }
   0x9   :  { %18 = vsyncpa [#allocation8], 0 }
   0xa   :  { %20 = vsyncpa [#allocation8 + $0x1], 0 }
   0xb   :  { %21 = vsyncpa [#allocation11], 0 }
   0xc   :  { %22 = vsyncpa [#allocation4], 0 }
   0xd   :  { %24 = vsyncpa [#allocation4 + $0x1], 0  ;;  %s2346_s30 = smov 0   ;;  %s2348_s10 = smov 0  }
   0xe   :  { %s2350_s11 = smov 0   ;;  %s2352_s12 = smov 0  }
   0xf LB: > { %2806 = sst [smem:[#allocation19_spill]] %s2265_s30  ;;  %s2367_s13 = sadd.s32 4294967295, %s2277_s12   ;;  %s2277_s12 = sphi %s2352_s12, %s2839_s12   ;;  %s2273_s11 = sphi %s2350_s11, %s2838_s11   ;;  %s2269_s10 = sphi %s2348_s10, %s2837_s10   ;;  %s2265_s30 = sphi %s2346_s30, %s2836_s30  }
  0x10   : > { %s1656_s14 = sadd.s32 4294967294, %s2277_s12   ;;  %p71_p0 = scmp.ne.s32.totalorder %s2269_s10, %s2265_s30 }
  0x11   : > { %p2793_p1 = scmp.eq.s32.totalorder %s2367_s13, 0  ;;  %p253_p3 = scmp.eq.s32.totalorder %s1656_s14, 1 }
  0x12   : > { %p1657_p5 = scmp.ge.s32.totalorder %s2277_s12, 1  ;;  %p260_p7 = scmp.lt.s32.totalorder %s2277_s12, 3 }
  0x13   : > { %p2376_p4 = por %p2793_p1, %p71_p0  ;;  %p2381_p6 = por %p253_p3, %p71_p0 }
  0x14   : > { %p2386_p8 = pnand %p1657_p5, %p260_p7  ;;  %s2279_s18 = smov [#allocation9]  }
  0x15   : > { %s2807_s15 = scalar_select %p2376_p4, 1, 0 }
  0x16   : > { %s2808_s16 = scalar_select %p2381_p6, 1, 0 }
  0x17   : > { %s284_s19 = sshll.u32 %s2279_s18, 4  ;;  %p1843_p9 = pneg %p2386_p8  ;;  %s2390_s19 = int_to_ptr.vmem [resolvable:$true] %s284_s19 }
  0x18   : > { %2809 = sst [smem:[#allocation20_spill]] %s2808_s16  ;;  %s2280_s21 = smov [#allocation10]  }
  0x19   : > { %p2397_p11 = pnand %p1843_p9, %p2793_p1  ;;  %s306_s22 = sshll.u32 %s2280_s21, 4  ;;  %s2401_s22 = int_to_ptr.vmem [resolvable:$true] %s306_s22 }
  0x1a   : > { %s2812_s4 = sld [smem:[#allocation23_spill]] }
  0x1b   : > { %p2411_p13 = pneg %p2397_p11 }
  0x20   : > { %s2066_s25 = scalar_lea.hbm %s2812_s4, 8192 }
  0x21   : > { %p2067_p12 = scmp.ne.s32.totalorder %s2812_s4, %s2066_s25  ;;  %p2073_p5 = scmp.lt.u32.totalorder %s2066_s25, %s2812_s4 }
  0x23   : > { %p2069_p0 = pnand %p2411_p13, %p2067_p12 }
  0x25   : > { %p2070_p3 = pneg %p2069_p0 }
  0x27   : > { %p2075_p7 = pnand %p2073_p5, %p2070_p3 }
  0x29   : > { %2078 = shalt.err (!%p2075_p7)
}
  0x2a   : > { %s2079_s18 = scalar_lea.vmem %s2390_s19, 8192  ;;  %p2087_p2 = scmp.lt.s32.totalorder %s2390_s19, %s2390_s19 }
  0x2b   : > { %p2080_p9 = scmp.ne.s32.totalorder %s2390_s19, %s2079_s18  ;;  %p2088_p6 = scmp.lt.s32.totalorder %s2079_s18, %s2079_s18 }
  0x2d   : > { %p2082_p10 = pnand %p2080_p9, %p2411_p13  ;;  %p2089_p12 = por %p2088_p6, %p2087_p2 }
  0x2f   : > { %p2083_p1 = pneg %p2082_p10 }
  0x31   : > { %p2090_p0 = pnand %p2089_p12, %p2083_p1 }
  0x33   : > { %2093 = shalt.err (!%p2090_p0)
}
  0x34   : > { %s2797_s21 = smov 128   ;;  %s2798_s23 = smov 8  }
  0x35   : > { %1849 = dma.hbm_to_vmem [thread:$0]  (!%p2397_p11), %s2812_s4, 8192, %s2390_s19, [#allocation8], %s2797_s21, %s2797_s21, %s2798_s23  }
  0x36   : > { %s2814_s0 = sld [smem:[#allocation21_spill]] }
  0x3c   : > { %s2094_s29 = scalar_lea.hbm %s2814_s0, 16 }
  0x3d   : > { %p2095_p1 = scmp.ne.s32.totalorder %s2814_s0, %s2094_s29  ;;  %p2101_p10 = scmp.lt.u32.totalorder %s2094_s29, %s2814_s0 }
  0x3f   : > { %p2097_p2 = pnand %p2095_p1, %p2411_p13 }
  0x41   : > { %p2098_p6 = pneg %p2097_p2 }
  0x43   : > { %p2103_p3 = pnand %p2101_p10, %p2098_p6 }
  0x45   : > { %2106 = shalt.err (!%p2103_p3)
}
  0x46   : > { %s2283_s9 = smov [#allocation2]   ;;  %s2815_s8 = sld [smem:[#allocation24_spill]] }
  0x47   : > { %1846 = dma.hbm_to_smem (!%p2397_p11), %s2814_s0, 16, %s2283_s9, [#allocation5]  }
  0x4c   : > { %s2107_s27 = scalar_lea.hbm %s2815_s8, 256 }
  0x4d   : > { %p2108_p5 = scmp.ne.s32.totalorder %s2815_s8, %s2107_s27  ;;  %p2114_p12 = scmp.lt.u32.totalorder %s2107_s27, %s2815_s8 }
  0x4f   : > { %p2110_p7 = pnand %p2108_p5, %p2411_p13 }
  0x51   : > { %p2111_p9 = pneg %p2110_p7 }
  0x53   : > { %p2116_p0 = pnand %p2114_p12, %p2111_p9 }
  0x55   : > { %2119 = shalt.err (!%p2116_p0)
}
  0x56   : > { %s2120_s9 = scalar_lea.vmem %s2401_s22, 256  ;;  %p2128_p10 = scmp.lt.s32.totalorder %s2401_s22, %s2401_s22 }
  0x57   : > { %p2121_p1 = scmp.ne.s32.totalorder %s2401_s22, %s2120_s9  ;;  %p2129_p3 = scmp.lt.s32.totalorder %s2120_s9, %s2120_s9 }
  0x59   : > { %p2123_p2 = pnand %p2121_p1, %p2411_p13  ;;  %p2130_p5 = por %p2129_p3, %p2128_p10 }
  0x5b   : > { %p2124_p6 = pneg %p2123_p2 }
  0x5d   : > { %p2131_p7 = pnand %p2130_p5, %p2124_p6 }
  0x5f   : > { %2134 = shalt.err (!%p2131_p7)
}
  0x60   : > { %s2284_s29 = smov 64   ;;  %s2285_s28 = smov 4  }
  0x61   : > { %1852 = dma.hbm_to_vmem [thread:$0]  (!%p2397_p11), %s2815_s8, 256, %s2401_s22, [#allocation11], %s2284_s29, %s2284_s29, %s2285_s28  }
  0x62   : > { %s2475_s25 = sadd.s32 1, %s2277_s12   ;;  %s58_s27 = sadd.s32 1, %s2273_s11 }
  0x63   : > { %s55_s26 = ssub.s32 %s2277_s12, %s2475_s25  ;;  %p65_p9 = scmp.ne.s32.totalorder %s2273_s11, %s2269_s10 }
  0x64   : > { %p56_p13 = scmp.eq.s32.totalorder %s55_s26, 0  ;;  %p66_p12 = scmp.eq.s32.totalorder %s2277_s12, 0 }
  0x65   : > { %p1867_p0 = scmp.lt.s32.totalorder %s2277_s12, 2  ;;  %p2816_p2 = scmp.eq.s32.totalorder %s2367_s13, 1 }
  0x66   : > { %s2485_s14 = scalar_select %p56_p13, %s2273_s11, %s58_s27  }
  0x67   : > { %p67_p1 = por %p66_p12, %p65_p9  ;;  %p2489_p6 = por %p2816_p2, %p65_p9 }
  0x68   : > { %s2494_s18 = sand.u32 1, %s2273_s11   ;;  %s1823_s22 = smul.u32 1536, %s2277_s12 }
  0x69   : > { %s2817_s20 = scalar_select %p2489_p6, 1, 0 }
  0x6a   : > { %s1822_s30 = smul.u32 96, %s2494_s18  ;;  %s2818_s1 = sld [smem:[#allocation22_spill]] }
  0x6b   : > { %p2503_p11 = pnand %p1867_p0, %p67_p1  ;;  %s321_s27 = scalar_lea.sflag [#allocation3], %s2494_s18 }
  0x6c   : > { %s324_s24 = scalar_lea.vmem [#allocation6], %s1822_s30 }
  0x6d   : > { %s331_s26 = sshll.u32 %s324_s24, 4  ;;  %p2137_p3 = pneg %p2503_p11  ;;  %s2508_s26 = int_to_ptr.vmem [resolvable:$true] %s331_s26 }
  0x70   : > { %s2501_s29 = scalar_lea.hbm %s2818_s1, %s1823_s22  ;;  %s2140_s9 = scalar_lea.hbm %s2818_s1, 3072 }
  0x71   : > { %s2135_s21 = scalar_lea.hbm %s2501_s29, 1536  ;;  %p2141_p13 = scmp.lt.u32.totalorder %s2501_s29, %s2818_s1 }
  0x72   : > { %p2136_p10 = scmp.ne.s32.totalorder %s2501_s29, %s2135_s21  ;;  %p2142_p9 = scmp.lt.u32.totalorder %s2140_s9, %s2135_s21 }
  0x73   : > { %p2144_p0 = scmp.lt.u32.totalorder %s2135_s21, %s2501_s29 }
  0x74   : > { %p2138_p5 = pnand %p2137_p3, %p2136_p10  ;;  %p2143_p12 = por %p2142_p9, %p2141_p13 }
  0x76   : > { %p2139_p7 = pneg %p2138_p5  ;;  %p2145_p1 = por %p2144_p0, %p2143_p12 }
  0x78   : > { %p2146_p2 = pnand %p2145_p1, %p2139_p7 }
  0x7a   : > { %2149 = shalt.err (!%p2146_p2)
}
  0x7b   : > { %s2150_s30 = scalar_lea.vmem %s2508_s26, 1536  ;;  %s2286_s24 = smov [#allocation6]  }
  0x7c   : > { %p2151_p10 = scmp.ne.s32.totalorder %s2508_s26, %s2150_s30  ;;  %s2155_s22 = sshll.u32 %s2286_s24, 4  ;;  %s2156_s22 = int_to_ptr.vmem [resolvable:$false] %s2155_s22 }
  0x7d   : > { %s2157_s0 = scalar_lea.vmem %s2156_s22, 3072  ;;  %p2158_p4 = scmp.lt.s32.totalorder %s2508_s26, %s2156_s22 }
  0x7e   : > { %p2153_p5 = pnand %p2151_p10, %p2137_p3  ;;  %p2159_p13 = scmp.lt.s32.totalorder %s2157_s0, %s2150_s30 }
  0x80   : > { %p2154_p6 = pneg %p2153_p5  ;;  %p2160_p9 = por %p2159_p13, %p2158_p4 }
  0x82   : > { %p2161_p12 = pnand %p2160_p9, %p2154_p6 }
  0x84   : > { %2164 = shalt.err (!%p2161_p12)
}
  0x85   : > { %s2820_s21 = smov 8   ;;  %s2821_s23 = smov 128  }
  0x86   : > { %1856 = dma.hbm_to_vmem [thread:$0]  (!%p2503_p11), %s2501_s29, 1536, %s2508_s26, %s321_s27, %s2821_s23, %s2821_s23, %s2820_s21  }
  0x87   : > { %s1663_s16 = sshll.u32 %s2494_s18, 6  ;;  %s1777_s9 = sshll.u32 %s2277_s12, 10 }
  0x88   : > { %s2546_s22 = scalar_lea.hbm %s2785_s2, %s1777_s9  ;;  %s345_s0 = scalar_lea.vmem [#allocation7], %s1663_s16 }
  0x89   : > { %s352_s19 = sshll.u32 %s345_s0, 4  ;;  %s2822_s1 = sand.u32 1, %s2277_s12   ;;  %s2548_s19 = int_to_ptr.vmem [resolvable:$true] %s352_s19 }
  0x8a   : > { %s2552_s4 = scalar_lea.sflag [#allocation8], %s2822_s1  ;;  %s2165_s8 = scalar_lea.hbm %s2546_s22, 1024 }
  0x8b   : > { %p2166_p4 = scmp.ne.s32.totalorder %s2546_s22, %s2165_s8  ;;  %s2170_s26 = scalar_lea.hbm %s2785_s2, 2048 }
  0x8c   : > { %p2171_p0 = scmp.lt.u32.totalorder %s2546_s22, %s2785_s2  ;;  %p2172_p1 = scmp.lt.u32.totalorder %s2170_s26, %s2165_s8 }
  0x8d   : > { %p2168_p6 = pnand %p2166_p4, %p2137_p3  ;;  %p2174_p10 = scmp.lt.u32.totalorder %s2165_s8, %s2546_s22 }
  0x8e   : > { %p2173_p2 = por %p2172_p1, %p2171_p0 }
  0x8f   : > { %p2169_p7 = pneg %p2168_p6 }
  0x90   : > { %p2175_p5 = por %p2174_p10, %p2173_p2 }
  0x92   : > { %p2176_p13 = pnand %p2175_p5, %p2169_p7 }
  0x94   : > { %2179 = shalt.err (!%p2176_p13)
}
  0x95   : > { %s2180_s1 = scalar_lea.vmem %s2548_s19, 1024  ;;  %s2287_s23 = smov [#allocation7]  }
  0x96   : > { %p2181_p9 = scmp.ne.s32.totalorder %s2548_s19, %s2180_s1  ;;  %s2185_s16 = sshll.u32 %s2287_s23, 4  ;;  %s2186_s16 = int_to_ptr.vmem [resolvable:$false] %s2185_s16 }
  0x97   : > { %s2187_s9 = scalar_lea.vmem %s2186_s16, 2048  ;;  %p2188_p6 = scmp.lt.s32.totalorder %s2548_s19, %s2186_s16 }
  0x98   : > { %p2183_p12 = pnand %p2181_p9, %p2137_p3  ;;  %p2189_p0 = scmp.lt.s32.totalorder %s2187_s9, %s2180_s1 }
  0x9a   : > { %p2184_p4 = pneg %p2183_p12  ;;  %p2190_p1 = por %p2189_p0, %p2188_p6 }
  0x9c   : > { %p2191_p2 = pnand %p2190_p1, %p2184_p4 }
  0x9e   : > { %2194 = shalt.err (!%p2191_p2)
}
  0x9f   : > { %s2288_s8 = smov 256   ;;  %s2289_s30 = smov 16  }
  0xa0   : > { %1859 = dma.hbm_to_vmem [thread:$0]  (!%p2503_p11), %s2546_s22, 1024, %s2548_s19, %s2552_s4, %s2288_s8, %s2288_s8, %s2289_s30  }
  0xa1   : > { %364 = sbr.rel (%p2386_p8) target bundleno = 1668 (0x684), region = 56  ;;  %p2823_p3 = scmp.eq.s32.totalorder (!%p2386_p8), %s2367_s13, 0 }
  0xa8   : > { %2240 = dma.done.wait (%p2823_p3), [#allocation5], 16   ;;  %p2824_p7 = pmov %p2823_p3 }
  0xa9   : > { %s2585_s24 = sand.u32 1, %s2269_s10   ;;  %p2825_p11 = scmp.ne.s32.totalorder %s2807_s15, 0 }
  0xaa   : > { %2242 = vsyncadd (%p2824_p7), [#allocation5], 4294967280  ;;  %s1824_s0 = smul.u32 96, %s2585_s24  ;;  %s371_s18 = scalar_lea.sflag [#allocation3], %s2585_s24 }
  0xac   : > { %s2589_s29 = scalar_lea.vmem [#allocation6], %s1824_s0 }
  0xad   : > { %2244 = dma.done.wait (%p2825_p11), %s371_s18, 1536  }
  0xae   : > { %2246 = vsyncadd (%p2825_p11), %s371_s18, 4294965760  ;;  %s379_s4 = sand.u32 1, %s2367_s13   ;;  %s1668_s17 = sshll.u32 %s2585_s24, 6 }
  0xaf   : > { %s380_s28 = scalar_lea.sflag [#allocation8], %s379_s4  ;;  %s2599_s19 = scalar_lea.vmem [#allocation7], %s1668_s17 }
  0xb0   : > { %2248 = dma.done.wait (%p2825_p11), %s380_s28, 1024  }
  0xb1   : > { %2250 = vsyncadd (%p2825_p11), %s380_s28, 4294966272  ;;  %p2826_p8 = pmov %p2823_p3 }
  0xb2   : > { %p2827_p10 = pmov %p2823_p3 }
  0xb3   : > { %2252 = dma.done.wait (%p2826_p8), [#allocation8], 8192  }
  0xb4   : > { %2254 = vsyncadd (%p2827_p10), [#allocation8], 4294959104  ;;  %p2828_p5 = pmov %p2823_p3 }
  0xb5   : > { %p2829_p13 = pmov %p2823_p3 }
  0xb6   : > { %2256 = dma.done.wait (%p2828_p5), [#allocation11], 256  }
  0xb7   : > { %2258 = vsyncadd (%p2829_p13), [#allocation11], 4294967040 }
  0xb8   : > { %396 = sfence }
  0xb9   : > { %v1920_v0 = vld [vmem:[%s2589_s29 + $0x4] ss:$8 sps:$4 sm:$0xff]   ;;  %v1922_v1 = vld [vmem:[%s2589_s29] ss:$8 sps:$4 sm:$0xff]   ;;  %v2290_v2 = vmov 0   ;;  %vm519_vm0 = vcmask 785408  }
  0xba   : > { %558 = vmatprep.mubr.bf16.mxu0 %v2290_v2  ;;  %1919 = vset.pattern.permute.xlu1 %v2290_v2  ;;  %v1923_v3 = vld [vmem:[%s2589_s29 + $0x14] ss:$8 sps:$4 sm:$0xff]   ;;  %v1925_v4 = vld [vmem:[%s2589_s29 + $0x10] ss:$8 sps:$4 sm:$0xff]   ;;  %v1926_v5 = vld [vmem:[%s2589_s29 + $0x24] ss:$8 sps:$4 sm:$0xff]  }
  0xbb   : > { %526 = vmatprep.subr.bf16.mxu0 %v1920_v0  ;;  %1918 = vset.pattern.permute.xlu0 %v2290_v2  ;;  %v1928_v6 = vld [vmem:[%s2589_s29 + $0x20] ss:$8 sps:$4 sm:$0xff]   ;;  %v1929_v7 = vld [vmem:[%s2589_s29 + $0x34] ss:$8 sps:$4 sm:$0xff]   ;;  %v1931_v8 = vld [vmem:[%s2589_s29 + $0x30] ss:$8 sps:$4 sm:$0xff]  }
  0xbc   : > { %527 = vmatpush1.bf16.msra.mxu0 %v1922_v1  ;;  %v1940_v9 = vld [vmem:[#allocation9 + $0x4] ss:$8 sps:$4 sm:$0xff]   ;;  %v1942_v10 = vld [vmem:[#allocation9] ss:$8 sps:$4 sm:$0xff]   ;;  %v1943_v12 = vld [vmem:[#allocation9 + $0x14] ss:$8 sps:$4 sm:$0xff]  }
  0xbd   : > { %528 = vmatprep.subr.bf16.mxu0 %v1923_v3  ;;  %v1932_v11 = vld [vmem:[%s2589_s29 + $0x44] ss:$8 sps:$4 sm:$0xff]   ;;  %1006 = vmatprep.subr.bf16.mxu1 %v1940_v9  ;;  %v1945_v13 = vld [vmem:[#allocation9 + $0x10] ss:$8 sps:$4 sm:$0xff]   ;;  %v1934_v15 = vld [vmem:[%s2589_s29 + $0x40] ss:$8 sps:$4 sm:$0xff]  }
  0xbe   : > { %1007 = vmatpush1.bf16.msra.mxu1 %v1942_v10  ;;  %v1946_v14 = vld [vmem:[#allocation9 + $0x24] ss:$8 sps:$4 sm:$0xff]   ;;  %v1935_v16 = vld [vmem:[%s2589_s29 + $0x54] ss:$8 sps:$4 sm:$0xff]   ;;  %v1948_v17 = vld [vmem:[#allocation9 + $0x20] ss:$8 sps:$4 sm:$0xff]  }
  0xbf   : > { %1008 = vmatprep.subr.bf16.mxu1 %v1943_v12  ;;  %v1949_v18 = vld [vmem:[#allocation9 + $0x34] ss:$8 sps:$4 sm:$0xff]   ;;  %v1937_v19 = vld [vmem:[%s2589_s29 + $0x50] ss:$8 sps:$4 sm:$0xff]   ;;  %v1938_v20 = vld [vmem:[%s2786_s3] sm:$0xff]   ;;  %vm1147_vm1 = vcmask 523264  }
  0xc0   : > { %529 = vmatpush1.bf16.msra.mxu0 %v1925_v4  ;;  %v1951_v21 = vld [vmem:[#allocation9 + $0x30] ss:$8 sps:$4 sm:$0xff]   ;;  %v1952_v22 = vld [vmem:[#allocation9 + $0x44] ss:$8 sps:$4 sm:$0xff]   ;;  %v1954_v23 = vld [vmem:[#allocation9 + $0x40] ss:$8 sps:$4 sm:$0xff]  }
  0xc1   : > { %530 = vmatprep.subr.bf16.mxu0 %v1926_v5  ;;  %v1955_v24 = vld [vmem:[#allocation9 + $0x54] ss:$8 sps:$4 sm:$0xff]   ;;  %v1957_v25 = vld [vmem:[#allocation9 + $0x50] ss:$8 sps:$4 sm:$0xff]   ;;  %v1939_v26 = vld [vmem:[%s2786_s3 + $0x8] sm:$0xff]   ;;  %vm2292_vm2 = vmmov 0  }
  0xc2   : > { %1009 = vmatpush1.bf16.msra.mxu1 %v1945_v13  ;;  %v1958_v27 = vld [vmem:[#allocation9 + $0x64] ss:$8 sps:$4 sm:$0xff]   ;;  %v1960_v28 = vld [vmem:[#allocation9 + $0x60] ss:$8 sps:$4 sm:$0xff]   ;;  %v1961_v29 = vld [vmem:[#allocation9 + $0x74] ss:$8 sps:$4 sm:$0xff]  }
  0xc3   : > { %1010 = vmatprep.subr.bf16.mxu1 %v1946_v14  ;;  %v1963_v30 = vld [vmem:[#allocation9 + $0x70] ss:$8 sps:$4 sm:$0xff]   ;;  %v1964_v31 = vld [vmem:[#allocation9 + $0x84] ss:$8 sps:$4 sm:$0xff]   ;;  %v1966_v32 = vld [vmem:[#allocation9 + $0x80] ss:$8 sps:$4 sm:$0xff]  }
  0xc4   : > { %531 = vmatpush1.bf16.msra.mxu0 %v1928_v6  ;;  %v1967_v33 = vld [vmem:[#allocation9 + $0x94] ss:$8 sps:$4 sm:$0xff]   ;;  %v1969_v34 = vld [vmem:[#allocation9 + $0x90] ss:$8 sps:$4 sm:$0xff]   ;;  %v1970_v35 = vld [vmem:[#allocation9 + $0xa4] ss:$8 sps:$4 sm:$0xff]  }
  0xc5   : > { %532 = vmatprep.subr.bf16.mxu0 %v1929_v7  ;;  %v1972_v36 = vld [vmem:[#allocation9 + $0xa0] ss:$8 sps:$4 sm:$0xff]   ;;  %v1973_v37 = vld [vmem:[#allocation9 + $0xb4] ss:$8 sps:$4 sm:$0xff]   ;;  %v1975_v38 = vld [vmem:[#allocation9 + $0xb0] ss:$8 sps:$4 sm:$0xff]  }
  0xc6   : > { %1011 = vmatpush1.bf16.msra.mxu1 %v1948_v17  ;;  %v1976_v39 = vld [vmem:[#allocation9 + $0xc4] ss:$8 sps:$4 sm:$0xff]   ;;  %v1978_v40 = vld [vmem:[#allocation9 + $0xc0] ss:$8 sps:$4 sm:$0xff]   ;;  %v1979_v41 = vld [vmem:[#allocation9 + $0xd4] ss:$8 sps:$4 sm:$0xff]  }
  0xc7   : > { %1012 = vmatprep.subr.bf16.mxu1 %v1949_v18  ;;  %v1981_v42 = vld [vmem:[#allocation9 + $0xd0] ss:$8 sps:$4 sm:$0xff]   ;;  %v1982_v43 = vld [vmem:[#allocation9 + $0xe4] ss:$8 sps:$4 sm:$0xff]   ;;  %v1984_v44 = vld [vmem:[#allocation9 + $0xe0] ss:$8 sps:$4 sm:$0xff]  }
  0xc8   : > { %533 = vmatpush1.bf16.msra.mxu0 %v1931_v8  ;;  %v1985_v45 = vld [vmem:[#allocation9 + $0xf4] ss:$8 sps:$4 sm:$0xff]   ;;  %v1987_v46 = vld [vmem:[#allocation9 + $0xf0] ss:$8 sps:$4 sm:$0xff]   ;;  %v1990_v47 = vld [vmem:[#allocation9 + $0x104] ss:$8 sps:$4 sm:$0xff]  }
  0xc9   : > { %534 = vmatprep.subr.bf16.mxu0 %v1932_v11  ;;  %vm1206_vm3 = vcmask 261120   ;;  %vm1266_vm4 = vcmask 15360   ;;  %vm1273_vm5 = vcmask 1040384   ;;  %s1767_s4 = sld [smem:[#allocation2 + $0x1]]  ;;  %s1350_s28 = sld [smem:[#allocation2]] }
  0xca   : > { %1013 = vmatpush1.bf16.msra.mxu1 %v1951_v21  ;;  %s431_s15 = scalar_lea.vmem [#allocation12], %s1668_s17  ;;  %s1778_s22 = sshll.u32 %s2367_s13, 10 }
  0xcb   : > { %1014 = vmatprep.subr.bf16.mxu1 %v1952_v22  ;;  %s1529_s26 = sshll.u32 %s431_s15, 4  ;;  %s2830_s21 = sld [smem:[#allocation25_spill]]  ;;  %s2739_s26 = int_to_ptr.vmem [resolvable:$true] %s1529_s26 }
  0xcc   : > { %535 = vmatpush1.bf16.msra.mxu0 %v1934_v15  ;;  %s1516_s13 = scalar_lea.sflag [#allocation4], %s2585_s24  ;;  %p2831_p12 = scmp.ne.s32.totalorder %s2817_s20, 0 }
  0xcd   : > { %536 = vmatprep.subr.bf16.mxu0 %v1935_v16  ;;  %s2293_s23 = smov [#allocation12]  }
  0xce   : > { %1015 = vmatpush1.bf16.msra.mxu1 %v1954_v23  ;;  %s2199_s16 = sshll.u32 %s2293_s23, 4  ;;  %s2200_s16 = int_to_ptr.vmem [resolvable:$false] %s2199_s16 }
  0xcf   : > { %1016 = vmatprep.subr.bf16.mxu1 %v1955_v24  ;;  %s2201_s9 = scalar_lea.vmem %s2200_s16, 2048  ;;  %p2202_p0 = scmp.lt.s32.totalorder %s2739_s26, %s2200_s16 }
  0xd0   : > { %537 = vmatpush1.bf16.msra.mxu0 %v1937_v19 }
  0xd1   : > { %s2737_s1 = scalar_lea.hbm %s2830_s21, %s1778_s22 }
  0xd2   : > { %1017 = vmatpush1.bf16.msra.mxu1 %v1957_v25 }
  0xd3   : > { %1686 = vmatmul.mubr.msk.bf16.vlgmr.msra.gmra.mrb[0].mxu0 %vm519_vm0, %v1938_v20  ;;  %1018 = vmatprep.subr.bf16.mxu1 %v1958_v27 }
  0xd4   : > { %568 = vmatprep.mubr.bf16.mxu0 %v2290_v2 }
  0xd6   : > { %1019 = vmatpush1.bf16.msra.mxu1 %v1960_v28 }
  0xd7   : > { %1020 = vmatprep.subr.bf16.mxu1 %v1961_v29 }
  0xda   : > { %1021 = vmatpush1.bf16.msra.mxu1 %v1963_v30 }
  0xdb   : > { %1687 = vmatmul.mubr.msk.bf16.gmra.mrb[4].mxu0 %vm519_vm0, %v1939_v26  ;;  %1022 = vmatprep.subr.bf16.mxu1 %v1964_v31 }
  0xde   : > { %1023 = vmatpush1.bf16.msra.mxu1 %v1966_v32 }
  0xdf   : > { %1024 = vmatprep.subr.bf16.mxu1 %v1967_v33  ;;  %v1988_v33 = vld [vmem:[#allocation9 + $0x100] ss:$8 sps:$4 sm:$0xff]  }
  0xe2   : > { %1025 = vmatpush1.bf16.msra.mxu1 %v1969_v34 }
  0xe3   : > { %1026 = vmatprep.subr.bf16.mxu1 %v1970_v35  ;;  %v1993_v35 = vld [vmem:[#allocation9 + $0x114] ss:$8 sps:$4 sm:$0xff]  }
  0xe6   : > { %1027 = vmatpush1.bf16.msra.mxu1 %v1972_v36 }
  0xe7   : > { %1028 = vmatprep.subr.bf16.mxu1 %v1973_v37  ;;  %v1991_v37 = vld [vmem:[#allocation9 + $0x110] ss:$8 sps:$4 sm:$0xff]  }
  0xea   : > { %1029 = vmatpush1.bf16.msra.mxu1 %v1975_v38  ;;  %v1996_v38 = vld [vmem:[#allocation9 + $0x124] ss:$8 sps:$4 sm:$0xff]  }
  0xeb   : > { %1030 = vmatprep.subr.bf16.mxu1 %v1976_v39  ;;  %v1994_v39 = vld [vmem:[#allocation9 + $0x120] ss:$8 sps:$4 sm:$0xff]  }
  0xee   : > { %1031 = vmatpush1.bf16.msra.mxu1 %v1978_v40  ;;  %v1999_v40 = vld [vmem:[#allocation9 + $0x134] ss:$8 sps:$4 sm:$0xff]  }
  0xef   : > { %1032 = vmatprep.subr.bf16.mxu1 %v1979_v41  ;;  %v1997_v41 = vld [vmem:[#allocation9 + $0x130] ss:$8 sps:$4 sm:$0xff]  }
  0xf2   : > { %1033 = vmatpush1.bf16.msra.mxu1 %v1981_v42  ;;  %v2002_v42 = vld [vmem:[#allocation9 + $0x144] ss:$8 sps:$4 sm:$0xff]  }
  0xf3   : > { %1034 = vmatprep.subr.bf16.mxu1 %v1982_v43  ;;  %v2036_v43 = vld [vmem:[%s2788_s5] sm:$0xff]  }
  0xf4   : > { %1799 = vmatprep.mubr.msk.bf16.mxu0 %vm1147_vm1, %v2036_v43 }
  0xf6   : > { %1035 = vmatpush1.bf16.msra.mxu1 %v1984_v44  ;;  %v2000_v44 = vld [vmem:[#allocation9 + $0x140] ss:$8 sps:$4 sm:$0xff]  }
  0xf7   : > { %1036 = vmatprep.subr.bf16.mxu1 %v1985_v45  ;;  %v2005_v45 = vld [vmem:[#allocation9 + $0x154] ss:$8 sps:$4 sm:$0xff]  }
  0xfa   : > { %1037 = vmatpush1.bf16.msra.mxu1 %v1987_v46  ;;  %v2003_v46 = vld [vmem:[#allocation9 + $0x150] ss:$8 sps:$4 sm:$0xff]  }
  0xfb   : > { %1047 = vmatprep.subr.bf16.mxu1 %v1990_v47  ;;  %v2008_v47 = vld [vmem:[#allocation9 + $0x164] ss:$8 sps:$4 sm:$0xff]  }
 0x1a6   : > { %v2635_v48 = vpop.f32.mrb[0].mxu0 }
 0x1a7   : > { %v2637_v49 = vpop.f32.mrb[1].mxu0 }
 0x1a8   : > { %v2639_v50 = vpop.f32.mrb[2].mxu0  ;;  %v1100_v51 = vadd.f32 %v2637_v49, %v2635_v48  ;;  %v1117_v52 = vmax.f32 %v2635_v48, %v2637_v49 }
 0x1a9   : > { %v597_v53 = vadd.f32 %v2639_v50, %v2635_v48  ;;  %v2647_v54 = vpop.f32.mrb[3].mxu0 }
 0x1aa   : > { %v606_v55 = vadd.f32 %v2647_v54, %v2637_v49  ;;  %1101 = vadd.xlane.f32.xlu0 %v1100_v51  ;;  %v1103_v56 = vadd.f32 %v2647_v54, %v2639_v50  ;;  %v1120_v57 = vmax.f32 %v2639_v50, %v2647_v54  ;;  %v2006_v51 = vld [vmem:[#allocation9 + $0x160] ss:$8 sps:$4 sm:$0xff]  }
 0x1ae   : > { %1104 = vadd.xlane.f32.xlu0 %v1103_v56  ;;  %v2655_v58 = vpop.f32.mrb[4].mxu0  ;;  %v2012_v56 = vld [vmem:[#allocation9 + $0x180] ss:$8 sps:$4 sm:$0xff]  }
 0x1af   : > { %v579_v59 = vmax.f32 %v2635_v48, %v2655_v58  ;;  %v598_v60 = vadd.f32 %v597_v53, %v2655_v58  ;;  %v2660_v61 = vpop.f32.mrb[5].mxu0  ;;  %v2009_v53 = vld [vmem:[#allocation9 + $0x170] ss:$8 sps:$4 sm:$0xff]  }
 0x1b0   : > { %v607_v62 = vadd.f32 %v606_v55, %v2660_v61  ;;  %v2663_v63 = vpop.f32.mrb[6].mxu0  ;;  %v1106_v0 = vadd.f32 %v2660_v61, %v2655_v58  ;;  %v1123_v1 = vmax.f32 %v2655_v58, %v2660_v61  ;;  %v588_v3 = vmax.f32 %v2637_v49, %v2660_v61  ;;  %v2014_v55 = vld [vmem:[#allocation9 + $0x184] ss:$8 sps:$4 sm:$0xff]  }
 0x1b1   : > { %v580_v4 = vmax.f32 %v2639_v50, %v2663_v63  ;;  %v2674_v5 = vadd.f32 %v598_v60, %v2663_v63  ;;  %v2676_v6 = vpop.f32.mrb[7].mxu0 }
 0x1b2   : > { %v608_v7 = vadd.f32 %v607_v62, %v2676_v6  ;;  %1118 = vmax.xlane.f32.xlu0 %v1117_v52  ;;  %1107 = vadd.xlane.f32.xlu1 %v1106_v0  ;;  %v1109_v8 = vadd.f32 %v2676_v6, %v2663_v63  ;;  %v1126_v9 = vmax.f32 %v2663_v63, %v2676_v6  ;;  %v2011_v52 = vld [vmem:[#allocation9 + $0x174] ss:$8 sps:$4 sm:$0xff]   ;;  %v2020_v62 = vld [vmem:[#allocation9 + $0x1a4] ss:$8 sps:$4 sm:$0xff]   ;;  %v2018_v0 = vld [vmem:[#allocation9 + $0x1a0] ss:$8 sps:$4 sm:$0xff]  }
 0x1b3   : > { %v589_v10 = vmax.f32 %v2647_v54, %v2676_v6  ;;  %v581_v11 = vmax.f32 %v579_v59, %v580_v4  ;;  %v2015_v59 = vld [vmem:[#allocation9 + $0x190] ss:$8 sps:$4 sm:$0xff]   ;;  %v600_v60 = vrot.slane %v2674_v5, 4 }
 0x1b4   : > { %v609_v12 = vrot.slane %v608_v7, 4  ;;  %v2021_v4 = vld [vmem:[#allocation9 + $0x1b0] ss:$8 sps:$4 sm:$0xff]  }
 0x1b5   : > { %v590_v13 = vmax.f32 %v588_v3, %v589_v10  ;;  %v582_v14 = vrot.slane %v581_v11, 4  ;;  %v2023_v3 = vld [vmem:[#allocation9 + $0x1b4] ss:$8 sps:$4 sm:$0xff]  }
 0x1b6   : > { %1124 = vmax.xlane.f32.xlu0 %v1123_v1  ;;  %1110 = vadd.xlane.f32.xlu1 %v1109_v8  ;;  %v610_v15 = vadd.f32 %v609_v12, %v608_v7  ;;  %v601_v1 = vadd.f32 %v600_v60, %v2674_v5  ;;  %v2026_v7 = vld [vmem:[#allocation9 + $0x1c4] ss:$8 sps:$4 sm:$0xff]   ;;  %v2029_v10 = vld [vmem:[#allocation9 + $0x1d4] ss:$8 sps:$4 sm:$0xff]   ;;  %v2027_v12 = vld [vmem:[#allocation9 + $0x1d0] ss:$8 sps:$4 sm:$0xff]  }
 0x1b7   : > { %v591_v16 = vrot.slane %v590_v13, 4  ;;  %v583_v17 = vmax.f32 %v581_v11, %v582_v14  ;;  %v2035_v5 = vld [vmem:[#allocation9 + $0x1f4] ss:$8 sps:$4 sm:$0xff]  }
 0x1b8   : > { %v611_v18 = vrot.slane %v610_v15, 2  ;;  %v602_v8 = vrot.slane %v601_v1, 2 }
 0x1b9   : > { %v592_v19 = vmax.f32 %v590_v13, %v591_v16  ;;  %v584_v20 = vrot.slane %v583_v17, 2  ;;  %v2032_v13 = vld [vmem:[#allocation9 + $0x1e4] ss:$8 sps:$4 sm:$0xff]  }
 0x1ba   : > { %1121 = vmax.xlane.f32.xlu1 %v1120_v57  ;;  %v612_v21 = vadd.f32 %v611_v18, %v610_v15  ;;  %v2017_v57 = vld [vmem:[#allocation9 + $0x194] ss:$8 sps:$4 sm:$0xff]   ;;  %v603_v11 = vadd.f32 %v602_v8, %v601_v1  ;;  %v2030_v15 = vld [vmem:[#allocation9 + $0x1e0] ss:$8 sps:$4 sm:$0xff]  }
 0x1bb   : > { %v593_v22 = vrot.slane %v592_v19, 2  ;;  %v585_v23 = vmax.f32 %v583_v17, %v584_v20  ;;  %v2033_v17 = vld [vmem:[#allocation9 + $0x1f0] ss:$8 sps:$4 sm:$0xff]  }
 0x1bc   : > { %v613_v24 = vrot.slane %v612_v21, 1  ;;  %v604_v14 = vrot.slane %v603_v11, 1 }
 0x1bd   : > { %v594_v25 = vmax.f32 %v592_v19, %v593_v22  ;;  %v586_v26 = vrot.slane %v585_v23, 1 }
 0x1be   : > { %1127 = vmax.xlane.f32.xlu1 %v1126_v9  ;;  %v614_v27 = vadd.f32 %v613_v24, %v612_v21  ;;  %v2024_v9 = vld [vmem:[#allocation9 + $0x1c0] ss:$8 sps:$4 sm:$0xff]   ;;  %v605_v16 = vadd.f32 %v604_v14, %v603_v11 }
 0x1bf   : > { %v595_v28 = vrot.slane %v594_v25, 1  ;;  %v587_v29 = vmax.f32 %v585_v23, %v586_v26 }
 0x1c0   : > { %v617_v31 = vmul.f32 0.03125, %v614_v27  ;;  %v616_v18 = vmul.f32 0.03125, %v605_v16 }
 0x1c1   : > { %v596_v30 = vmax.f32 %v594_v25, %v595_v28  ;;  %v618_v34 = vpack.c.bf16 %v587_v29, %v587_v29 }
 0x1c2   : > { %v621_v36 = vpack.c.bf16 %v617_v31, %v617_v31  ;;  %v620_v19 = vpack.c.bf16 %v616_v18, %v616_v18 }
 0x1c3   : > { %v619_v32 = vpack.c.bf16 %v596_v30, %v596_v30 }
 0x1c5   : > { %1038 = vmatprep.mubr.bf16.mxu1 %v619_v32 }
 0x1c6   : > { %1039 = vmatmul.mubr.bf16.vlgmr.msra.gmra.mrb[0].mxu1 %v618_v34 }
 0x1c7   : > { %1048 = vmatpush1.bf16.msra.mxu1 %v1988_v33  ;;  %1079 = vmatprep.mubr.bf16.mxu1 %v621_v36  ;;  %v2037_v36 = vld [vmem:[%s2788_s5 + $0x8] sm:$0xff]  }
 0x1c8   : > { %1049 = vmatprep.subr.bf16.mxu1 %v1993_v35 }
 0x1cb   : > { %1050 = vmatpush1.bf16.msra.mxu1 %v1991_v37  ;;  %v2291_v37 = vmov 0.0  }
 0x1cc   : > { %1051 = vmatprep.subr.bf16.mxu1 %v1996_v38 }
 0x1cf   : > { %1052 = vmatpush1.bf16.msra.mxu1 %v1994_v39 }
 0x1d0   : > { %1053 = vmatprep.subr.bf16.mxu1 %v1999_v40 }
 0x1d3   : > { %1054 = vmatpush1.bf16.msra.mxu1 %v1997_v41 }
 0x1d4   : > { %1055 = vmatprep.subr.bf16.mxu1 %v2002_v42 }
 0x1d7   : > { %1056 = vmatpush1.bf16.msra.mxu1 %v2000_v44 }
 0x1d8   : > { %1057 = vmatprep.subr.bf16.mxu1 %v2005_v45 }
 0x1db   : > { %1058 = vmatpush1.bf16.msra.mxu1 %v2003_v46 }
 0x1dc   : > { %1059 = vmatprep.subr.bf16.mxu1 %v2008_v47 }
 0x1df   : > { %1060 = vmatpush1.bf16.msra.mxu1 %v2006_v51  ;;  %v1203_v51 = vld [vmem:[%s2789_s6] sm:$0x1] }
 0x1e0   : > { %1061 = vmatprep.subr.bf16.mxu1 %v2011_v52  ;;  %v2038_v52 = vld [vmem:[%s2790_s7] sm:$0xff]  }
 0x1e3   : > { %1062 = vmatpush1.bf16.msra.mxu1 %v2009_v53 }
 0x1e4   : > { %1063 = vmatprep.subr.bf16.mxu1 %v2014_v55 }
 0x1e7   : > { %1064 = vmatpush1.bf16.msra.mxu1 %v2012_v56 }
 0x1e8   : > { %1065 = vmatprep.subr.bf16.mxu1 %v2017_v57 }
 0x1eb   : > { %1066 = vmatpush1.bf16.msra.mxu1 %v2015_v59 }
 0x1ec   : > { %1067 = vmatprep.subr.bf16.mxu1 %v2020_v62 }
 0x1ef   : > { %1068 = vmatpush1.bf16.msra.mxu1 %v2018_v0  ;;  %v2039_v0 = vld [vmem:[%s2790_s7 + $0x8] sm:$0xff]  }
 0x1f0   : > { %1069 = vmatprep.subr.bf16.mxu1 %v2023_v3 }
 0x1f3   : > { %1070 = vmatpush1.bf16.msra.mxu1 %v2021_v4 }
 0x1f4   : > { %1071 = vmatprep.subr.bf16.mxu1 %v2026_v7 }
 0x1f7   : > { %1072 = vmatpush1.bf16.msra.mxu1 %v2024_v9 }
 0x1f8   : > { %1073 = vmatprep.subr.bf16.mxu1 %v2029_v10 }
 0x1fb   : > { %1074 = vmatpush1.bf16.msra.mxu1 %v2027_v12 }
 0x1fc   : > { %1075 = vmatprep.subr.bf16.mxu1 %v2032_v13 }
 0x1ff   : > { %1076 = vmatpush1.bf16.msra.mxu1 %v2030_v15 }
 0x200   : > { %1077 = vmatprep.subr.bf16.mxu1 %v2035_v5 }
 0x203   : > { %1078 = vmatpush1.bf16.msra.mxu1 %v2033_v17 }
 0x206   : > { %1080 = vmatmul.mubr.bf16.vlgmr.msra.gmra.mrb[0].mxu1 %v620_v19  ;;  %v1357_v19 = vstv %s1767_s4 }
 0x237   : > { %v1102_v20 = vpop.xlane.xlu0 %1101 }
 0x238   : > { %v1113_v22 = vmul.f32 0.00390625, %v1102_v20 }
 0x23b   : > { %v1105_v21 = vpop.xlane.xlu0 %1104 }
 0x23c   : > { %v1114_v23 = vmul.f32 0.00390625, %v1105_v21 }
 0x23e   : > { %v1129_v24 = vpack.c.bf16 %v1114_v23, %v1113_v22 }
 0x23f   : > { %v1108_v25 = vpop.xlane.xlu1 %1107  ;;  %v1119_v29 = vpop.xlane.xlu0 %1118 }
 0x240   : > { %1791 = vmatprep.subr.bf16.mxu0 %v1129_v24  ;;  %v1115_v27 = vmul.f32 0.00390625, %v1108_v25 }
 0x241   : > { %1792 = vmatpush3.bf16.msra.mxu0 %v1129_v24 }
 0x243   : > { %v1111_v26 = vpop.xlane.xlu1 %1110  ;;  %v1125_v33 = vpop.xlane.xlu0 %1124 }
 0x244   : > { %v1116_v28 = vmul.f32 0.00390625, %v1111_v26 }
 0x246   : > { %v1130_v30 = vpack.c.bf16 %v1116_v28, %v1115_v27 }
 0x247   : > { %v1122_v31 = vpop.xlane.xlu1 %1121 }
 0x248   : > { %v1131_v32 = vpack.c.bf16 %v1122_v31, %v1119_v29  ;;  %1793 = vmatprep.subr.bf16.mxu0 %v1130_v30 }
 0x249   : > { %1794 = vmatpush3.bf16.msra.mxu0 %v1130_v30 }
 0x24a   : > { %1795 = vmatprep.subr.bf16.mxu0 %v1131_v32 }
 0x24b   : > { %v1128_v34 = vpop.xlane.xlu1 %1127 }
 0x24c   : > { %v1132_v35 = vpack.c.bf16 %v1128_v34, %v1125_v33 }
 0x24d   : > { %1796 = vmatpush3.bf16.msra.mxu0 %v1131_v32 }
 0x24e   : > { %1797 = vmatprep.subr.bf16.mxu0 %v1132_v35 }
 0x251   : > { %1798 = vmatpush3.bf16.msra.mxu0 %v1132_v35  ;;  %v1362_v35 = vlaneseq }
 0x252   : > { %1803 = vmatprep.subr.bf16.mxu0 %v2291_v37 }
 0x254   : > { %1800 = vmatmul.mubr.msk.bf16.vlgmr.msra.gmra.mrb[8].mxu0 %vm1147_vm1, %v2037_v36 }
 0x255   : > { %1807 = vmatprep.mubr.msk.bf16.mxu0 %vm2292_vm2, %v2291_v37 }
 0x2d9   : > { %v2695_v38 = vpop.f32.mrb[0].mxu1 }
 0x2da   : > { %v2697_v39 = vpop.f32.mrb[1].mxu1  ;;  %v1752_v28 = vmul.f32 -1.442695, %v2695_v38 }
 0x2db   : > { %v1085_v40 = vpop.f32.mrb[2].mxu1  ;;  %v1753_v29 = vmul.f32 -1.442695, %v2697_v39 }
 0x2dc   : > { %v1086_v41 = vpop.f32.mrb[3].mxu1  ;;  %v1363_v40 = vshrl.u32 %v1362_v35, 7 }
 0x327   : > { %v1801_v42 = vpop.f32.mrb[8].mxu0 }
 0x328   : > { %v1188_v43 = vpop.f32.mrb[9].mxu0 }
 0x329   : > { %v1802_v44 = vpop.f32.mrb[10].mxu0 }
 0x32a   : > { %v1205_v45 = vpack.c.bf16 %v1802_v44, %v1801_v42  ;;  %v1191_v46 = vpop.f32.mrb[11].mxu0 }
 0x32b   : > { %v1204_v47 = vpack.c.bf16 %v1191_v46, %v1188_v43  ;;  %v1364_v43 = vsub.s32 0, %v1363_v40 }
 0x32d   : > { %1804 = vmatpush3.bf16.msra.mxu0 %v1204_v47 }
 0x32e   : > { %1805 = vmatprep.subr.bf16.mxu0 %v2291_v37  ;;  %v1352_v37 = vstv %s1350_s28 }
 0x331   : > { %1806 = vmatpush3.bf16.msra.mxu0 %v1205_v45 }
 0x334   : > { %1808 = vmatmul.mubr.msk.bf16.vlgmr.msra.gmra.mrb[12].mxu0 %vm1206_vm3, %v1203_v51 }
 0x335   : > { %1813 = vmatprep.mubr.msk.bf16.mxu0 %vm1266_vm4, %v2038_v52 }
 0x407   : > { %v1244_v53 = vpop.f32.mrb[12].mxu0 }
 0x408   : > { %v1250_v55 = vmax.f32 %v1244_v53, 0.0  ;;  %v1809_v56 = vpop.f32.mrb[13].mxu0 }
 0x409   : > { %v1247_v57 = vpop.f32.mrb[14].mxu0 }
 0x40a   : > { %v1255_v59 = vpack.c.bf16 %v1250_v55, %v1250_v55  ;;  %v1810_v60 = vpop.f32.mrb[15].mxu0 }
 0x40c   : > { %v1275_v62 = vsel %vm1273_vm5, %v1255_v59, 0  ;;  %1821 = vmatprep.subr.msk.bf16.mxu0 %vm1273_vm5, %v1255_v59 }
 0x40d   : > { %1812 = vmatpush3.bf16.msra.mxu0 %v1275_v62 }
 0x410   : > { %1814 = vmatmul.mubr.msk.bf16.vlgmr.msra.gmra.mrb[16].mxu0 %vm1266_vm4, %v2039_v0 }
 0x411   : > { %1470 = vmatprep.mubr.bf16.mxu0 %v2290_v2 }
 0x4e3   : > { %v1815_v1 = vpop.f32.mrb[16].mxu0 }
 0x4e4   : > { %v1765_v3 = vmul.f32 -1.442695, %v1815_v1  ;;  %v1311_v4 = vpop.f32.mrb[17].mxu0 }
 0x4e5   : > { %v1763_v7 = vmul.f32 -1.442695, %v1311_v4  ;;  %v1816_v8 = vpop.f32.mrb[18].mxu0 }
 0x4e6   : > { %2042 = vpow2.f32 %v1765_v3  ;;  %v1766_v9 = vmul.f32 -1.442695, %v1816_v8  ;;  %v1314_v10 = vpop.f32.mrb[19].mxu0 }
 0x4e7   : > { %2044 = vpow2.f32 %v1763_v7  ;;  %v1764_v11 = vmul.f32 -1.442695, %v1314_v10 }
 0x4e8   : > { %2046 = vpow2.f32 %v1766_v9 }
 0x4e9   : > { %2048 = vpow2.f32 %v1764_v11 }
 0x4f0   : > { %v2043_v12 = vpop.eup %2042 }
 0x4f1   : > { %v2045_v13 = vpop.eup %2044  ;;  %v1340_v14 = vadd.f32 1.0, %v2043_v12  ;;  %v1411_v12 = vld [vmem:[%s2599_s19 + $0x8] sm:$0xff] }
 0x4f2   : > { %v2047_v15 = vpop.eup %2046  ;;  %v1338_v5 = vadd.f32 1.0, %v2045_v13 }
 0x4f3   : > { %v2049_v16 = vpop.eup %2048  ;;  %2050 = vrcp.f32 %v1340_v14  ;;  %v1341_v18 = vadd.f32 1.0, %v2047_v15 }
 0x4f4   : > { %2052 = vrcp.f32 %v1338_v5  ;;  %v1339_v17 = vadd.f32 1.0, %v2049_v16  ;;  %v1413_v5 = vld [vmem:[%s2599_s19 + $0x18] sm:$0xff] }
 0x4f6   : > { %2054 = vrcp.f32 %v1339_v17 }
 0x4f7   : > { %2056 = vrcp.f32 %v1341_v18 }
 0x4f8   : > { %2058 = vpow2.f32 %v1752_v28 }
 0x4f9   : > { %2060 = vpow2.f32 %v1753_v29 }
 0x4fd   : > { %v2051_v20 = vpop.eup %2050 }
 0x4fe   : > { %v2053_v21 = vpop.eup %2052  ;;  %v1360_v22 = vmul.f32 %v2051_v20, %v1357_v19 }
 0x4ff   : > { %v1358_v23 = vmul.f32 %v2053_v21, %v1357_v19 }
 0x500   : > { %v2055_v24 = vpop.eup %2054  ;;  %1382 = vperm.xlu1 %1919, %v1360_v22  }
 0x501   : > { %1372 = vperm.xlu0 %1918, %v1358_v23   ;;  %v1359_v25 = vmul.f32 %v2055_v24, %v1357_v19  ;;  %v2057_v26 = vpop.eup %2056  ;;  %v1414_v24 = vld [vmem:[%s2599_s19 + $0x20] sm:$0xff] }
 0x502   : > { %v1361_v27 = vmul.f32 %v2057_v26, %v1357_v19  ;;  %v2059_v30 = vpop.eup %2058 }
 0x503   : > { %v2061_v31 = vpop.eup %2060  ;;  %v1094_v32 = vadd.f32 1.0, %v2059_v30  ;;  %v1417_v30 = vld [vmem:[%s2599_s19 + $0x38] sm:$0xff] }
 0x504   : > { %1377 = vperm.xlu1 %1919, %v1359_v25   ;;  %v1095_v33 = vadd.f32 1.0, %v2061_v31  ;;  %v1415_v25 = vld [vmem:[%s2599_s19 + $0x28] sm:$0xff] }
 0x505   : > { %2062 = vrcp.f32 %v1094_v32 }
 0x506   : > { %2064 = vrcp.f32 %v1095_v33 }
 0x508   : > { %1387 = vperm.xlu1 %1919, %v1361_v27   ;;  %v1416_v27 = vld [vmem:[%s2599_s19 + $0x30] sm:$0xff] }
 0x50f   : > { %v2063_v34 = vpop.eup %2062 }
 0x510   : > { %v2065_v36 = vpop.eup %2064  ;;  %v1353_v41 = vmul.f32 %v2063_v34, %v1352_v37 }
 0x511   : > { %v1354_v42 = vmul.f32 %v2065_v36, %v1352_v37 }
 0x512   : > { %v1355_v38 = vadd.f32 1.0, %v1353_v41 }
 0x513   : > { %v1356_v44 = vadd.f32 1.0, %v1354_v42 }
 0x514   : > { %v1365_v39 = vrot.slane %v1355_v38, %v1364_v43 }
 0x515   : > { %v1369_v45 = vrot.slane %v1356_v44, %v1364_v43 }
 0x57f   : > { %v1383_v46 = vpop.permute.xlu1 %1382 }
 0x580   : > { %v1394_v47 = vadd.f32 %v1383_v46, %v1365_v39  ;;  %v1395_v51 = vadd.f32 %v1383_v46, %v1369_v45  ;;  %v1373_v52 = vpop.permute.xlu0 %1372 }
 0x581   : > { %v1390_v53 = vadd.f32 %v1373_v52, %v1365_v39  ;;  %v1391_v55 = vadd.f32 %v1373_v52, %v1369_v45 }
 0x582   : > { %v1402_v56 = vmul.f32 %v1394_v47, %v2655_v58  ;;  %v1403_v57 = vmul.f32 %v1395_v51, %v2660_v61 }
 0x583   : > { %v1398_v59 = vmul.f32 %v1390_v53, %v2635_v48  ;;  %v1399_v60 = vmul.f32 %v1391_v55, %v2637_v49  ;;  %v1378_v62 = vpop.permute.xlu1 %1377 }
 0x584   : > { %v1392_v0 = vadd.f32 %v1378_v62, %v1365_v39  ;;  %v1393_v1 = vadd.f32 %v1378_v62, %v1369_v45 }
 0x586   : > { %v1400_v3 = vmul.f32 %v1392_v0, %v2639_v50  ;;  %v1401_v4 = vmul.f32 %v1393_v1, %v2647_v54  ;;  %v2040_v50 = vld [vmem:[#allocation10] sm:$0xff]   ;;  %v2041_v54 = vld [vmem:[#allocation10 + $0x8] sm:$0xff]  }
 0x587   : > { %v1388_v7 = vpop.permute.xlu1 %1387 }
 0x588   : > { %v1406_v8 = vpack.c.bf16 %v1400_v3, %v1398_v59  ;;  %v1396_v9 = vadd.f32 %v1388_v7, %v1365_v39  ;;  %v1397_v10 = vadd.f32 %v1388_v7, %v1369_v45  ;;  %v1407_v58 = vpack.c.bf16 %v1401_v4, %v1399_v60 }
 0x58a   : > { %v1404_v61 = vmul.f32 %v1396_v9, %v2663_v63  ;;  %v1405_v48 = vmul.f32 %v1397_v10, %v2676_v6  ;;  %1438 = vmatprep.subr.bf16.mxu0 %v1407_v58  ;;  %v1410_v63 = vld [vmem:[%s2599_s19] sm:$0xff]  ;;  %v1412_v6 = vld [vmem:[%s2599_s19 + $0x10] sm:$0xff]  ;;  %s2195_s19 = scalar_lea.vmem %s2739_s26, 1024 }
 0x58b   : > { %1439 = vmatpush1.bf16.msra.mxu0 %v1406_v8  ;;  %p2196_p9 = scmp.ne.s32.totalorder %s2739_s26, %s2195_s19  ;;  %p2203_p1 = scmp.lt.s32.totalorder %s2201_s9, %s2195_s19 }
 0x58c   : > { %v1408_v49 = vpack.c.bf16 %v1404_v61, %v1402_v56  ;;  %v1409_v11 = vpack.c.bf16 %v1405_v48, %v1403_v57 }
 0x58d   : > { %p2197_p4 = pnand %p2196_p9, %p2831_p12  ;;  %p2204_p2 = por %p2203_p1, %p2202_p0 }
 0x58e   : > { %1440 = vmatprep.subr.bf16.mxu0 %v1409_v11 }
 0x58f   : > { %1441 = vmatpush1.bf16.msra.mxu0 %v1408_v49  ;;  %p2198_p6 = pneg %p2197_p4 }
 0x591   : > { %p2205_p3 = pnand %p2204_p2, %p2198_p6 }
 0x592   : > { %1770 = vmatmul.mubr.msk.bf16.vlgmr.msra.gmra.mrb[20].mxu0 %vm1206_vm3, %v2040_v50 }
 0x593   : > { %1480 = vmatprep.mubr.bf16.mxu0 %v2290_v2 }
 0x59a   : > { %1771 = vmatmul.mubr.msk.bf16.gmra.mrb[24].mxu0 %vm1206_vm3, %v2041_v54 }
 0x665   : > { %v1472_v13 = vpop.f32.mrb[20].mxu0 }
 0x666   : > { %v1491_v14 = vadd.f32 %v1472_v13, %v1410_v63  ;;  %v1474_v15 = vpop.f32.mrb[21].mxu0 }
 0x667   : > { %v1492_v16 = vadd.f32 %v1474_v15, %v1411_v12  ;;  %v1476_v17 = vpop.f32.mrb[22].mxu0 }
 0x668   : > { %v1499_v18 = vmax.f32 %v1491_v14, 0.0  ;;  %v1493_v19 = vadd.f32 %v1476_v17, %v1412_v6  ;;  %v1478_v20 = vpop.f32.mrb[23].mxu0 }
 0x669   : > { %v1500_v2 = vmax.f32 %v1492_v16, 0.0  ;;  %v1494_v21 = vadd.f32 %v1478_v20, %v1413_v5 }
 0x66a   : > { %1507 = vst [vmem:[%s431_s15] sm:$0xff] %v1499_v18  ;;  %v1501_v22 = vmax.f32 %v1493_v19, 0.0 }
 0x66b   : > { %1508 = vst [vmem:[%s431_s15 + $0x8] sm:$0xff] %v1500_v2  ;;  %v1502_v23 = vmax.f32 %v1494_v21, 0.0 }
 0x66c   : > { %1509 = vst [vmem:[%s431_s15 + $0x10] sm:$0xff] %v1501_v22 }
 0x66d   : > { %1510 = vst [vmem:[%s431_s15 + $0x18] sm:$0xff] %v1502_v23  ;;  %v1482_v26 = vpop.f32.mrb[24].mxu0 }
 0x66e   : > { %v1495_v28 = vadd.f32 %v1482_v26, %v1414_v24  ;;  %v1484_v29 = vpop.f32.mrb[25].mxu0 }
 0x66f   : > { %v1496_v31 = vadd.f32 %v1484_v29, %v1415_v25  ;;  %v1486_v32 = vpop.f32.mrb[26].mxu0 }
 0x670   : > { %v1503_v33 = vmax.f32 %v1495_v28, 0.0  ;;  %v1497_v34 = vadd.f32 %v1486_v32, %v1416_v27  ;;  %v1488_v35 = vpop.f32.mrb[27].mxu0 }
 0x671   : > { %v1504_v36 = vmax.f32 %v1496_v31, 0.0  ;;  %v1498_v37 = vadd.f32 %v1488_v35, %v1417_v30 }
 0x672   : > { %1511 = vst [vmem:[%s431_s15 + $0x20] sm:$0xff] %v1503_v33  ;;  %v1505_v40 = vmax.f32 %v1497_v34, 0.0 }
 0x673   : > { %1512 = vst [vmem:[%s431_s15 + $0x28] sm:$0xff] %v1504_v36  ;;  %v1506_v41 = vmax.f32 %v1498_v37, 0.0 }
 0x674   : > { %1513 = vst [vmem:[%s431_s15 + $0x30] sm:$0xff] %v1505_v40 }
 0x675   : > { %1514 = vst [vmem:[%s431_s15 + $0x38] sm:$0xff] %v1506_v41 }
 0x676   : > { %2208 = shalt.err (!%p2205_p3)
}
 0x677   : > { %s2209_s8 = scalar_lea.hbm %s2737_s1, 1024  ;;  %s2213_s18 = scalar_lea.hbm %s2830_s21, 2048 }
 0x678   : > { %p2210_p7 = scmp.ne.s32.totalorder %s2737_s1, %s2209_s8  ;;  %p2214_p10 = scmp.lt.u32.totalorder %s2737_s1, %s2830_s21 }
 0x679   : > { %p2215_p5 = scmp.lt.u32.totalorder %s2213_s18, %s2209_s8  ;;  %p2217_p9 = scmp.lt.u32.totalorder %s2209_s8, %s2737_s1 }
 0x67a   : > { %p2211_p11 = pnand %p2210_p7, %p2831_p12 }
 0x67b   : > { %p2216_p13 = por %p2215_p5, %p2214_p10 }
 0x67c   : > { %p2212_p8 = pneg %p2211_p11 }
 0x67d   : > { %p2218_p4 = por %p2217_p9, %p2216_p13 }
 0x67f   : > { %p2219_p6 = pnand %p2218_p4, %p2212_p8 }
 0x681   : > { %2222 = shalt.err (!%p2219_p6)
}
 0x682   : > { %s2294_s28 = smov 256   ;;  %s2295_s15 = smov 16  }
 0x683   : > { %1841 = dma.vmem_to_hbm [thread:$0]  (%p2831_p12), %s2739_s26, 1024, %s2737_s1, %s1516_s13, %s2294_s28, %s2294_s28, %s2295_s15  }
 0x684 PF: > { %s2832_s22 = sld [smem:[#allocation19_spill]]  ;;  %s2833_s17 = sld [smem:[#allocation20_spill]] }
 0x685   : > { %p2835_p1 = scmp.ge.s32.totalorder %s2277_s12, 2 }
 0x68a   : > { %s1544_s27 = sand.u32 1, %s2832_s22   ;;  %p2834_p0 = scmp.ne.s32.totalorder %s2833_s17, 0 }
 0x68b   : > { %s1545_s19 = scalar_lea.sflag [#allocation4], %s1544_s27 }
 0x68c   : > { %p1861_p2 = pnand %p2835_p1, %p2834_p0 }
 0x68e   : > { %2260 = dma.done.wait (!%p1861_p2), %s1545_s19, 1024  }
 0x68f   : > { %2262 = vsyncadd (!%p1861_p2), %s1545_s19, 4294966272  ;;  %p27_p3 = scmp.ge.s32.totalorder %s2475_s25, 4   ;;  %s2836_s30 = smov %s2269_s10 }
 0x690   : > { %s2837_s10 = smov %s2273_s11  ;;  %s2838_s11 = smov %s2485_s14 }
 0x691   : > { %s2839_s12 = smov %s2475_s25  ;;  %29 = sbr.rel (!%p27_p3) target bundleno = 15 (0xf), region = 127 }
 0x698   :  { %1550 = vsyncpa [#allocation3], 1 }
 0x699   :  { %1552 = vsyncpa [#allocation3 + $0x1], 1 }
 0x69a   :  { %1553 = vsyncpa [#allocation8], 1 }
 0x69b   :  { %1555 = vsyncpa [#allocation8 + $0x1], 1 }
 0x69c   :  { %1556 = vsyncpa [#allocation11], 1 }
 0x69d   :  { %1557 = vsyncpa [#allocation4], 1 }
 0x69e   :  { %1559 = vsyncpa [#allocation4 + $0x1], 1 }
 0x69f   :  { %1560 = vsyncpa [#allocation5], 1 }
 0x6a0   :  { %1562 = vsyncpa [#allocation5 + $0x1], 1 }

</bundles_post_ra>
